<compile_context>
chip_gen: v7x
topology: tpu7x:2x2x1
jax: 0.10.0
libtpu: 0.0.40
codegen_flags: <defaults>
</compile_context>

<pallas_src>
import jax
import jax.numpy as jnp
from jax.experimental import pallas as pl
from jax.experimental.pallas import tpu as pltpu

HIDDEN1 = 400
HIDDEN2 = 300
H1_PAD = 512          # next multiple of 128 (clean 2x256 MXU tiles)
H2_PAD = 384
LANE = 128
LN_EPS = 1e-5


def _round_up(x, m):
    return (x + m - 1) // m * m


def _masked_layernorm(h, gamma, beta, n_valid):
    """PyTorch LayerNorm over the first n_valid lanes of a lane-padded tile.

    h: (TB, N_pad) f32.  gamma/beta: (1, N_pad) f32, zero on padded lanes, so
    padded lanes of the output are exactly 0.  Biased variance, eps inside
    the rsqrt, divisor = n_valid (the true feature count, not the padded one).
    """
    lane = jax.lax.broadcasted_iota(jnp.int32, h.shape, dimension=1)
    mask = lane < n_valid
    inv_n = 1.0 / float(n_valid)
    hm = jnp.where(mask, h, 0.0)
    mu = jnp.sum(hm, axis=-1, keepdims=True) * inv_n
    d = jnp.where(mask, h - mu, 0.0)
    var = jnp.sum(d * d, axis=-1, keepdims=True) * inv_n
    return d * jax.lax.rsqrt(var + LN_EPS) * gamma + beta


def ddpg_actor_kernel(x_ref,
                      w1_ref, b1_ref, g1_ref, be1_ref,
                      w2_ref, b2_ref, g2_ref, be2_ref,
                      w3_ref, b3_ref,
                      o_ref):
    # Layer 1: Linear -> LayerNorm -> ReLU   (bf16 matmul operands, f32 acc)
    x = x_ref[...].astype(jnp.bfloat16)
    h = jnp.dot(x, w1_ref[...], preferred_element_type=jnp.float32)
    h = h + b1_ref[...]
    h = _masked_layernorm(h, g1_ref[...], be1_ref[...], HIDDEN1)
    h = jnp.maximum(h, 0.0)

    # Layer 2: Linear -> LayerNorm -> ReLU
    h = jnp.dot(h.astype(jnp.bfloat16), w2_ref[...],
                preferred_element_type=jnp.float32)
    h = h + b2_ref[...]
    h = _masked_layernorm(h, g2_ref[...], be2_ref[...], HIDDEN2)
    h = jnp.maximum(h, 0.0)

    # Layer 3: Linear -> Sigmoid (exp + approx reciprocal both run on the EUP)
    o = jnp.dot(h.astype(jnp.bfloat16), w3_ref[...],
                preferred_element_type=jnp.float32)
    o = o + b3_ref[...]
    o_ref[...] = pl.reciprocal(1.0 + jnp.exp(-o), approx=True)


def ddpg_actor_forward_padded(x, kparams):
    """Runs the kernel on (B, obs) f32 input, returns (B_pad, ACT_PAD) f32."""
    (w1, b1, g1, be1, w2, b2, g2, be2, w3, b3) = kparams
    B, obs = x.shape
    act_pad = w3.shape[1]

    # Batch tile: tiny batches -> single block; large batches -> pipelined,
    # megacore-parallel grid with resident weights.
    TB = min(256, _round_up(B, 8))
    B_pad = _round_up(B, TB)
    if B_pad != B:
        x = jnp.pad(x, ((0, B_pad - B), (0, 0)))
    grid = (B_pad // TB,)

    def resident(arr):
        # Full-array block with a constant block index: stays resident in
        # VMEM across all batch tiles (no per-step re-DMA).
        return pl.BlockSpec(arr.shape, lambda i: (0, 0))

    in_specs = [
        pl.BlockSpec((TB, obs), lambda i: (i, 0)),           # x: batch-tiled
        resident(w1), resident(b1), resident(g1), resident(be1),
        resident(w2), resident(b2), resident(g2), resident(be2),
        resident(w3), resident(b3),
    ]
    out_specs = pl.BlockSpec((TB, act_pad), lambda i: (i, 0))

    return pl.pallas_call(
        ddpg_actor_kernel,
        out_shape=jax.ShapeDtypeStruct((B_pad, act_pad), jnp.float32),
        grid=grid,
        in_specs=in_specs,
        out_specs=out_specs,
        compiler_params=pltpu.CompilerParams(
            dimension_semantics=("parallel",)),
    )(x, w1, b1, g1, be1, w2, b2, g2, be2, w3, b3)


def ddpg_actor_apply(x, kparams, act_size):
    B = x.shape[0]
    out = ddpg_actor_forward_padded(x, kparams)
    return out[:B, :act_size]


# ----------------------------------------------------------------------------
# Parameter construction (PyTorch-style init) + packing for the kernel.
# ----------------------------------------------------------------------------

def init_params(key, obs_size, act_size):
    """Unpadded f32 parameters, (in, out) weight layout (= x @ W + b)."""
    ks = jax.random.split(key, 6)
    s1 = 1.0 / jnp.sqrt(obs_size)
    s2 = 1.0 / jnp.sqrt(HIDDEN1)
    s3 = 1.0 / jnp.sqrt(HIDDEN2)
    w1 = jax.random.uniform(ks[0], (obs_size, HIDDEN1), jnp.float32, -s1, s1)
    b1 = jax.random.uniform(ks[1], (1, HIDDEN1), jnp.float32, -s1, s1)
    g1 = jnp.ones((1, HIDDEN1), jnp.float32)
    be1 = jnp.zeros((1, HIDDEN1), jnp.float32)
    w2 = jax.random.uniform(ks[2], (HIDDEN1, HIDDEN2), jnp.float32, -s2, s2)
    b2 = jax.random.uniform(ks[3], (1, HIDDEN2), jnp.float32, -s2, s2)
    g2 = jnp.ones((1, HIDDEN2), jnp.float32)
    be2 = jnp.zeros((1, HIDDEN2), jnp.float32)
    w3 = jax.random.uniform(ks[4], (HIDDEN2, act_size), jnp.float32, -s3, s3)
    b3 = jax.random.uniform(ks[5], (1, act_size), jnp.float32, -s3, s3)
    return (w1, b1, g1, be1, w2, b2, g2, be2, w3, b3)


def pack_params(params, act_size):
    """Pad feature dims to 128-multiples and cast matmul weights to bf16.

    Zero padding keeps the padded lanes exactly zero through the network;
    LayerNorm masking in the kernel keeps the statistics over 400/300 lanes.
    """
    (w1, b1, g1, be1, w2, b2, g2, be2, w3, b3) = params
    act_pad = _round_up(act_size, LANE)

    def pad2(a, rows, cols):
        return jnp.pad(a, ((0, rows - a.shape[0]), (0, cols - a.shape[1])))

    w1p = pad2(w1, w1.shape[0], H1_PAD).astype(jnp.bfloat16)
    b1p = pad2(b1, 1, H1_PAD)
    g1p = pad2(g1, 1, H1_PAD)          # padded gamma lanes are zero
    be1p = pad2(be1, 1, H1_PAD)
    w2p = pad2(w2, H1_PAD, H2_PAD).astype(jnp.bfloat16)
    b2p = pad2(b2, 1, H2_PAD)
    g2p = pad2(g2, 1, H2_PAD)
    be2p = pad2(be2, 1, H2_PAD)
    w3p = pad2(w3, H2_PAD, act_pad).astype(jnp.bfloat16)
    b3p = pad2(b3, 1, act_pad)
    return (w1p, b1p, g1p, be1p, w2p, b2p, g2p, be2p, w3p, b3p)


def reference_forward(x, params):
    """Pure-JAX f32 reference matching the PyTorch module."""
    (w1, b1, g1, be1, w2, b2, g2, be2, w3, b3) = params

    def ln(h, g, b):
        mu = jnp.mean(h, axis=-1, keepdims=True)
        var = jnp.mean((h - mu) ** 2, axis=-1, keepdims=True)
        return (h - mu) / jnp.sqrt(var + LN_EPS) * g + b

    h = jnp.maximum(ln(x @ w1 + b1, g1, be1), 0.0)
    h = jnp.maximum(ln(h @ w2 + b2, g2, be2), 0.0)
    return jax.nn.sigmoid(h @ w3 + b3)


if __name__ == "__main__":
    key = jax.random.PRNGKey(0)
    k_x, k_p = jax.random.split(key)

    batch, obs_size, act_size = 4, 32, 8
    x = jax.random.normal(k_x, (batch, obs_size), jnp.float32)

    ref_params = init_params(k_p, obs_size, act_size)
    kern_params = pack_params(ref_params, act_size)

    out = ddpg_actor_apply(x, kern_params, act_size)
    out = jax.block_until_ready(out)

    ref = reference_forward(x, ref_params)
    assert out.shape == (batch, act_size)
    # Tolerance accounts for bf16 matmul operands + approx reciprocal;
    # structure/normalization must still match the f32 PyTorch-style reference.
    assert jnp.allclose(out, ref, atol=3e-2, rtol=3e-2), "mismatch vs JAX reference"

    print("KERNEL_OK")
</pallas_src>

<mosaic_0001>
module attributes {stable_mosaic.version = 11 : i64} {
  func.func @ddpg_actor_kernel(%arg0: i32, %arg1: memref<8x32xf32, #tpu.memory_space<vmem>>, %arg2: memref<32x512xbf16, #tpu.memory_space<vmem>>, %arg3: memref<1x512xf32, #tpu.memory_space<vmem>>, %arg4: memref<1x512xf32, #tpu.memory_space<vmem>>, %arg5: memref<1x512xf32, #tpu.memory_space<vmem>>, %arg6: memref<512x384xbf16, #tpu.memory_space<vmem>>, %arg7: memref<1x384xf32, #tpu.memory_space<vmem>>, %arg8: memref<1x384xf32, #tpu.memory_space<vmem>>, %arg9: memref<1x384xf32, #tpu.memory_space<vmem>>, %arg10: memref<384x128xbf16, #tpu.memory_space<vmem>>, %arg11: memref<1x128xf32, #tpu.memory_space<vmem>>, %arg12: memref<8x128xf32, #tpu.memory_space<vmem>>) attributes {dimension_semantics = [#tpu.dimension_semantics<parallel>], iteration_bounds = array<i64: 1>, scalar_prefetch = 0 : i64, scratch_operands = 0 : i64, tpu.core_type = #tpu.core_type<tc>, window_params = [{transform_indices = @transform_0, window_bounds = array<i64: 8, 32>}, {pipeline_mode = #tpu.pipeline_mode<synchronous>, transform_indices = @transform_1, window_bounds = array<i64: 32, 512>}, {pipeline_mode = #tpu.pipeline_mode<synchronous>, transform_indices = @transform_2, window_bounds = array<i64: 1, 512>}, {pipeline_mode = #tpu.pipeline_mode<synchronous>, transform_indices = @transform_3, window_bounds = array<i64: 1, 512>}, {pipeline_mode = #tpu.pipeline_mode<synchronous>, transform_indices = @transform_4, window_bounds = array<i64: 1, 512>}, {pipeline_mode = #tpu.pipeline_mode<synchronous>, transform_indices = @transform_5, window_bounds = array<i64: 512, 384>}, {pipeline_mode = #tpu.pipeline_mode<synchronous>, transform_indices = @transform_6, window_bounds = array<i64: 1, 384>}, {pipeline_mode = #tpu.pipeline_mode<synchronous>, transform_indices = @transform_7, window_bounds = array<i64: 1, 384>}, {pipeline_mode = #tpu.pipeline_mode<synchronous>, transform_indices = @transform_8, window_bounds = array<i64: 1, 384>}, {pipeline_mode = #tpu.pipeline_mode<synchronous>, transform_indices = @transform_9, window_bounds = array<i64: 384, 128>}, {pipeline_mode = #tpu.pipeline_mode<synchronous>, transform_indices = @transform_10, window_bounds = array<i64: 1, 128>}, {transform_indices = @transform_11, window_bounds = array<i64: 8, 128>}]} {
    %c0 = arith.constant 0 : index
    %c0_0 = arith.constant 0 : index
    %0 = vector.load %arg1[%c0, %c0_0] : memref<8x32xf32, #tpu.memory_space<vmem>>, vector<8x32xf32>
    %1 = arith.truncf %0 : vector<8x32xf32> to vector<8x32xbf16>
    %c0_1 = arith.constant 0 : index
    %c0_2 = arith.constant 0 : index
    %2 = vector.load %arg2[%c0_1, %c0_2] : memref<32x512xbf16, #tpu.memory_space<vmem>>, vector<32x512xbf16>
    %cst = arith.constant dense<0.000000e+00> : vector<8x512xf32>
    %3 = tpu.matmul %1, %2, %cst {dimension_numbers = #tpu.dot_dimension_numbers<[1], [0], [0], [1], [0, 0, 1, 1], [], []>} : vector<8x32xbf16>, vector<32x512xbf16>, vector<8x512xf32> -> vector<8x512xf32>
    %c0_3 = arith.constant 0 : index
    %c0_4 = arith.constant 0 : index
    %4 = vector.load %arg3[%c0_3, %c0_4] : memref<1x512xf32, #tpu.memory_space<vmem>>, vector<1x512xf32>
    %5 = vector.broadcast %4 : vector<1x512xf32> to vector<8x512xf32>
    %6 = arith.addf %3, %5 : vector<8x512xf32>
    %c0_5 = arith.constant 0 : index
    %c0_6 = arith.constant 0 : index
    %7 = vector.load %arg4[%c0_5, %c0_6] : memref<1x512xf32, #tpu.memory_space<vmem>>, vector<1x512xf32>
    %c0_7 = arith.constant 0 : index
    %c0_8 = arith.constant 0 : index
    %8 = vector.load %arg5[%c0_7, %c0_8] : memref<1x512xf32, #tpu.memory_space<vmem>>, vector<1x512xf32>
    %9 = tpu.iota {dimensions = array<i32: 1>} : vector<8x512xi32>
    %c400_i32 = arith.constant 400 : i32
    %10 = vector.broadcast %c400_i32 : i32 to vector<8x512xi32>
    %11 = arith.cmpi slt, %9, %10 : vector<8x512xi32>
    %cst_9 = arith.constant 0.000000e+00 : f32
    %12 = vector.broadcast %cst_9 : f32 to vector<8x512xf32>
    %13 = arith.select %11, %6, %12 : vector<8x512xi1>, vector<8x512xf32>
    %cst_10 = arith.constant dense<0.000000e+00> : vector<8xf32>
    %14 = vector.multi_reduction <add>, %13, %cst_10 [1] : vector<8x512xf32> to vector<8xf32>
    %15 = vector.shape_cast %14 : vector<8xf32> to vector<8x1xf32>
    %cst_11 = arith.constant 2.500000e-03 : f32
    %16 = vector.broadcast %cst_11 : f32 to vector<8x1xf32>
    %17 = arith.mulf %15, %16 : vector<8x1xf32>
    %18 = vector.broadcast %17 : vector<8x1xf32> to vector<8x512xf32>
    %19 = arith.subf %6, %18 : vector<8x512xf32>
    %cst_12 = arith.constant 0.000000e+00 : f32
    %20 = vector.broadcast %cst_12 : f32 to vector<8x512xf32>
    %21 = arith.select %11, %19, %20 : vector<8x512xi1>, vector<8x512xf32>
    %22 = arith.mulf %21, %21 : vector<8x512xf32>
    %cst_13 = arith.constant dense<0.000000e+00> : vector<8xf32>
    %23 = vector.multi_reduction <add>, %22, %cst_13 [1] : vector<8x512xf32> to vector<8xf32>
    %24 = vector.shape_cast %23 : vector<8xf32> to vector<8x1xf32>
    %cst_14 = arith.constant 2.500000e-03 : f32
    %25 = vector.broadcast %cst_14 : f32 to vector<8x1xf32>
    %26 = arith.mulf %24, %25 : vector<8x1xf32>
    %cst_15 = arith.constant 9.99999974E-6 : f32
    %27 = vector.broadcast %cst_15 : f32 to vector<8x1xf32>
    %28 = arith.addf %26, %27 : vector<8x1xf32>
    %29 = math.rsqrt %28 : vector<8x1xf32>
    %30 = vector.broadcast %29 : vector<8x1xf32> to vector<8x512xf32>
    %31 = arith.mulf %21, %30 : vector<8x512xf32>
    %32 = vector.broadcast %7 : vector<1x512xf32> to vector<8x512xf32>
    %33 = arith.mulf %31, %32 : vector<8x512xf32>
    %34 = vector.broadcast %8 : vector<1x512xf32> to vector<8x512xf32>
    %35 = arith.addf %33, %34 : vector<8x512xf32>
    %cst_16 = arith.constant 0.000000e+00 : f32
    %36 = vector.broadcast %cst_16 : f32 to vector<8x512xf32>
    %37 = arith.maximumf %35, %36 : vector<8x512xf32>
    %38 = arith.truncf %37 : vector<8x512xf32> to vector<8x512xbf16>
    %c0_17 = arith.constant 0 : index
    %c0_18 = arith.constant 0 : index
    %39 = vector.load %arg6[%c0_17, %c0_18] : memref<512x384xbf16, #tpu.memory_space<vmem>>, vector<512x384xbf16>
    %cst_19 = arith.constant dense<0.000000e+00> : vector<8x384xf32>
    %40 = tpu.matmul %38, %39, %cst_19 {dimension_numbers = #tpu.dot_dimension_numbers<[1], [0], [0], [1], [0, 0, 1, 1], [], []>} : vector<8x512xbf16>, vector<512x384xbf16>, vector<8x384xf32> -> vector<8x384xf32>
    %c0_20 = arith.constant 0 : index
    %c0_21 = arith.constant 0 : index
    %41 = vector.load %arg7[%c0_20, %c0_21] : memref<1x384xf32, #tpu.memory_space<vmem>>, vector<1x384xf32>
    %42 = vector.broadcast %41 : vector<1x384xf32> to vector<8x384xf32>
    %43 = arith.addf %40, %42 : vector<8x384xf32>
    %c0_22 = arith.constant 0 : index
    %c0_23 = arith.constant 0 : index
    %44 = vector.load %arg8[%c0_22, %c0_23] : memref<1x384xf32, #tpu.memory_space<vmem>>, vector<1x384xf32>
    %c0_24 = arith.constant 0 : index
    %c0_25 = arith.constant 0 : index
    %45 = vector.load %arg9[%c0_24, %c0_25] : memref<1x384xf32, #tpu.memory_space<vmem>>, vector<1x384xf32>
    %46 = tpu.iota {dimensions = array<i32: 1>} : vector<8x384xi32>
    %c300_i32 = arith.constant 300 : i32
    %47 = vector.broadcast %c300_i32 : i32 to vector<8x384xi32>
    %48 = arith.cmpi slt, %46, %47 : vector<8x384xi32>
    %cst_26 = arith.constant 0.000000e+00 : f32
    %49 = vector.broadcast %cst_26 : f32 to vector<8x384xf32>
    %50 = arith.select %48, %43, %49 : vector<8x384xi1>, vector<8x384xf32>
    %cst_27 = arith.constant dense<0.000000e+00> : vector<8xf32>
    %51 = vector.multi_reduction <add>, %50, %cst_27 [1] : vector<8x384xf32> to vector<8xf32>
    %52 = vector.shape_cast %51 : vector<8xf32> to vector<8x1xf32>
    %cst_28 = arith.constant 0.00333333341 : f32
    %53 = vector.broadcast %cst_28 : f32 to vector<8x1xf32>
    %54 = arith.mulf %52, %53 : vector<8x1xf32>
    %55 = vector.broadcast %54 : vector<8x1xf32> to vector<8x384xf32>
    %56 = arith.subf %43, %55 : vector<8x384xf32>
    %cst_29 = arith.constant 0.000000e+00 : f32
    %57 = vector.broadcast %cst_29 : f32 to vector<8x384xf32>
    %58 = arith.select %48, %56, %57 : vector<8x384xi1>, vector<8x384xf32>
    %59 = arith.mulf %58, %58 : vector<8x384xf32>
    %cst_30 = arith.constant dense<0.000000e+00> : vector<8xf32>
    %60 = vector.multi_reduction <add>, %59, %cst_30 [1] : vector<8x384xf32> to vector<8xf32>
    %61 = vector.shape_cast %60 : vector<8xf32> to vector<8x1xf32>
    %cst_31 = arith.constant 0.00333333341 : f32
    %62 = vector.broadcast %cst_31 : f32 to vector<8x1xf32>
    %63 = arith.mulf %61, %62 : vector<8x1xf32>
    %cst_32 = arith.constant 9.99999974E-6 : f32
    %64 = vector.broadcast %cst_32 : f32 to vector<8x1xf32>
    %65 = arith.addf %63, %64 : vector<8x1xf32>
    %66 = math.rsqrt %65 : vector<8x1xf32>
    %67 = vector.broadcast %66 : vector<8x1xf32> to vector<8x384xf32>
    %68 = arith.mulf %58, %67 : vector<8x384xf32>
    %69 = vector.broadcast %44 : vector<1x384xf32> to vector<8x384xf32>
    %70 = arith.mulf %68, %69 : vector<8x384xf32>
    %71 = vector.broadcast %45 : vector<1x384xf32> to vector<8x384xf32>
    %72 = arith.addf %70, %71 : vector<8x384xf32>
    %cst_33 = arith.constant 0.000000e+00 : f32
    %73 = vector.broadcast %cst_33 : f32 to vector<8x384xf32>
    %74 = arith.maximumf %72, %73 : vector<8x384xf32>
    %75 = arith.truncf %74 : vector<8x384xf32> to vector<8x384xbf16>
    %c0_34 = arith.constant 0 : index
    %c0_35 = arith.constant 0 : index
    %76 = vector.load %arg10[%c0_34, %c0_35] : memref<384x128xbf16, #tpu.memory_space<vmem>>, vector<384x128xbf16>
    %cst_36 = arith.constant dense<0.000000e+00> : vector<8x128xf32>
    %77 = tpu.matmul %75, %76, %cst_36 {dimension_numbers = #tpu.dot_dimension_numbers<[1], [0], [0], [1], [0, 0, 1, 1], [], []>} : vector<8x384xbf16>, vector<384x128xbf16>, vector<8x128xf32> -> vector<8x128xf32>
    %c0_37 = arith.constant 0 : index
    %c0_38 = arith.constant 0 : index
    %78 = vector.load %arg11[%c0_37, %c0_38] : memref<1x128xf32, #tpu.memory_space<vmem>>, vector<1x128xf32>
    %79 = vector.broadcast %78 : vector<1x128xf32> to vector<8x128xf32>
    %80 = arith.addf %77, %79 : vector<8x128xf32>
    %cst_39 = arith.constant 0.000000e+00 : f32
    %81 = vector.broadcast %cst_39 : f32 to vector<8x128xf32>
    %82 = arith.subf %81, %80 : vector<8x128xf32>
    %83 = math.exp %82 : vector<8x128xf32>
    %cst_40 = arith.constant 1.000000e+00 : f32
    %84 = vector.broadcast %cst_40 : f32 to vector<8x128xf32>
    %85 = arith.addf %84, %83 : vector<8x128xf32>
    %86 = tpu.reciprocal %85 {approx = true} : vector<8x128xf32> -> vector<8x128xf32>
    %c0_41 = arith.constant 0 : index
    %c0_42 = arith.constant 0 : index
    %87 = vector.load %arg12[%c0_41, %c0_42] : memref<8x128xf32, #tpu.memory_space<vmem>>, vector<8x128xf32>
    tpu.vector_store %arg12[%c0_41, %c0_42], %86 {strides = array<i32>} : memref<8x128xf32, #tpu.memory_space<vmem>>, vector<8x128xf32>,
    return
  }
  func.func @transform_0(%arg0: i32) -> (i32, i32) {
    %c0_i32 = arith.constant 0 : i32
    %c0_i32_0 = arith.constant 0 : i32
    return %arg0, %c0_i32 : i32, i32
  }
  func.func @transform_1(%arg0: i32) -> (i32, i32) {
    %c0_i32 = arith.constant 0 : i32
    %c0_i32_0 = arith.constant 0 : i32
    %c0_i32_1 = arith.constant 0 : i32
    return %c0_i32, %c0_i32_0 : i32, i32
  }
  func.func @transform_2(%arg0: i32) -> (i32, i32) {
    %c0_i32 = arith.constant 0 : i32
    %c0_i32_0 = arith.constant 0 : i32
    %c0_i32_1 = arith.constant 0 : i32
    return %c0_i32, %c0_i32_0 : i32, i32
  }
  func.func @transform_3(%arg0: i32) -> (i32, i32) {
    %c0_i32 = arith.constant 0 : i32
    %c0_i32_0 = arith.constant 0 : i32
    %c0_i32_1 = arith.constant 0 : i32
    return %c0_i32, %c0_i32_0 : i32, i32
  }
  func.func @transform_4(%arg0: i32) -> (i32, i32) {
    %c0_i32 = arith.constant 0 : i32
    %c0_i32_0 = arith.constant 0 : i32
    %c0_i32_1 = arith.constant 0 : i32
    return %c0_i32, %c0_i32_0 : i32, i32
  }
  func.func @transform_5(%arg0: i32) -> (i32, i32) {
    %c0_i32 = arith.constant 0 : i32
    %c0_i32_0 = arith.constant 0 : i32
    %c0_i32_1 = arith.constant 0 : i32
    return %c0_i32, %c0_i32_0 : i32, i32
  }
  func.func @transform_6(%arg0: i32) -> (i32, i32) {
    %c0_i32 = arith.constant 0 : i32
    %c0_i32_0 = arith.constant 0 : i32
    %c0_i32_1 = arith.constant 0 : i32
    return %c0_i32, %c0_i32_0 : i32, i32
  }
  func.func @transform_7(%arg0: i32) -> (i32, i32) {
    %c0_i32 = arith.constant 0 : i32
    %c0_i32_0 = arith.constant 0 : i32
    %c0_i32_1 = arith.constant 0 : i32
    return %c0_i32, %c0_i32_0 : i32, i32
  }
  func.func @transform_8(%arg0: i32) -> (i32, i32) {
    %c0_i32 = arith.constant 0 : i32
    %c0_i32_0 = arith.constant 0 : i32
    %c0_i32_1 = arith.constant 0 : i32
    return %c0_i32, %c0_i32_0 : i32, i32
  }
  func.func @transform_9(%arg0: i32) -> (i32, i32) {
    %c0_i32 = arith.constant 0 : i32
    %c0_i32_0 = arith.constant 0 : i32
    %c0_i32_1 = arith.constant 0 : i32
    return %c0_i32, %c0_i32_0 : i32, i32
  }
  func.func @transform_10(%arg0: i32) -> (i32, i32) {
    %c0_i32 = arith.constant 0 : i32
    %c0_i32_0 = arith.constant 0 : i32
    %c0_i32_1 = arith.constant 0 : i32
    return %c0_i32, %c0_i32_0 : i32, i32
  }
  func.func @transform_11(%arg0: i32) -> (i32, i32) {
    %c0_i32 = arith.constant 0 : i32
    %c0_i32_0 = arith.constant 0 : i32
    return %arg0, %c0_i32 : i32, i32
  }
}

</mosaic_0001>

<bundles_post_ra>
// kernel: tpu_custom_call.1
= control target key start
LH: loop header
LB: loop body
LE: loop exit
PB: predicated region body
PF: predicated region fallthrough
CT: control target
= control target key end

     0   :  { %16 = vsyncpa [#allocation3], 0  ;;  %s2337_s0 = inlined_call_operand.hbm [shape: f32[8,32], index: 0, kind: input, shape index: {}]   ;;  %s2338_s1 = inlined_call_operand.hbm [shape: bf16[32,512], index: 1, kind: input, shape index: {}]   ;;  %s2339_s2 = inlined_call_operand.vmem [shape: f32[1,512], index: 2, kind: input, shape index: {}]   ;;  %s2340_s3 = inlined_call_operand.vmem [shape: f32[1,512], index: 3, kind: input, shape index: {}]   ;;  %s2341_s4 = inlined_call_operand.vmem [shape: f32[1,512], index: 4, kind: input, shape index: {}]   ;;  %s2342_s5 = inlined_call_operand.hbm [shape: bf16[512,384], index: 5, kind: input, shape index: {}]   ;;  %s2343_s6 = inlined_call_operand.vmem [shape: f32[1,384], index: 6, kind: input, shape index: {}]   ;;  %s2344_s7 = inlined_call_operand.vmem [shape: f32[1,384], index: 7, kind: input, shape index: {}]   ;;  %s2345_s8 = inlined_call_operand.vmem [shape: f32[1,384], index: 8, kind: input, shape index: {}]   ;;  %s2346_s9 = inlined_call_operand.hbm [shape: bf16[384,128], index: 9, kind: input, shape index: {}]   ;;  %s2347_s10 = inlined_call_operand.vmem [shape: f32[1,128], index: 10, kind: input, shape index: {}]   ;;  %s2348_s11 = inlined_call_operand.hbm [shape: f32[8,128], index: 11, kind: output, shape index: {}]  }
   0x1   :  { %17 = vsyncpa [#allocation6], 0 }
   0x2   :  { %18 = vsyncpa [#allocation9], 0 }
   0x3   :  { %19 = vsyncpa [#allocation4], 0  ;;  %s2087_s17 = smov [#allocation5]   ;;  %s1969_s21 = scalar_lea.hbm %s2338_s1, 1024 }
   0x4   :  { %s35_s18 = sshll.u32 %s2087_s17, 4  ;;  %p1970_p0 = scmp.ne.s32.totalorder %s2338_s1, %s1969_s21  ;;  %s36_s18 = int_to_ptr.vmem [resolvable:$true] %s35_s18 }
   0x5   :  { %p1973_p1 = scmp.lt.u32.totalorder %s1969_s21, %s2338_s1 }
   0x7   :  { %p1975_p2 = pnand %p1973_p1, %p1970_p0 }
   0x9   :  { %1978 = shalt.err (!%p1975_p2)
}
   0xa   :  { %s1979_s26 = scalar_lea.vmem %s36_s18, 1024  ;;  %p1984_p4 = scmp.lt.s32.totalorder %s36_s18, %s36_s18 }
   0xb   :  { %p1980_p3 = scmp.ne.s32.totalorder %s36_s18, %s1979_s26  ;;  %p1985_p5 = scmp.lt.s32.totalorder %s1979_s26, %s1979_s26 }
   0xd   :  { %p1986_p6 = por %p1985_p5, %p1984_p4 }
   0xf   :  { %p1987_p7 = pnand %p1986_p6, %p1980_p3 }
  0x11   :  { %1990 = shalt.err (!%p1987_p7)
}
  0x12   :  { %s2088_s27 = smov 256   ;;  %s2089_s28 = smov 16  }
  0x13   :  { %41 = dma.hbm_to_vmem [thread:$0]  %s2338_s1, 1024, %s36_s18, [#allocation6], %s2088_s27, %s2088_s27, %s2089_s28  }
  0x14   :  { %s2090_s12 = smov [#allocation2]   ;;  %s2091_s14 = smov [#allocation7]  }
  0x15   :  { %s26_s13 = sshll.u32 %s2090_s12, 4  ;;  %s53_s15 = sshll.u32 %s2091_s14, 4  ;;  %s27_s13 = int_to_ptr.vmem [resolvable:$true] %s26_s13  ;;  %s54_s15 = int_to_ptr.vmem [resolvable:$true] %s53_s15 }
  0x16   :  { %s1991_s19 = scalar_lea.hbm %s2337_s0, 128 }
  0x17   :  { %p1992_p8 = scmp.ne.s32.totalorder %s2337_s0, %s1991_s19  ;;  %p1995_p9 = scmp.lt.u32.totalorder %s1991_s19, %s2337_s0 }
  0x19   :  { %p1997_p10 = pnand %p1995_p9, %p1992_p8 }
  0x1b   :  { %2000 = shalt.err (!%p1997_p10)
}
  0x1c   :  { %s2001_s1 = scalar_lea.vmem %s27_s13, 128  ;;  %p2006_p12 = scmp.lt.s32.totalorder %s27_s13, %s27_s13 }
  0x1d   :  { %p2002_p11 = scmp.ne.s32.totalorder %s27_s13, %s2001_s1  ;;  %p2007_p13 = scmp.lt.s32.totalorder %s2001_s1, %s2001_s1 }
  0x1f   :  { %p2008_p0 = por %p2007_p13, %p2006_p12 }
  0x21   :  { %p2009_p1 = pnand %p2008_p0, %p2002_p11 }
  0x23   :  { %2012 = shalt.err (!%p2009_p1)
}
  0x24   :  { %29 = dma.hbm_to_vmem [thread:$0]  %s2337_s0, 128, %s27_s13, [#allocation3]  }
  0x25   :  { %s2013_s27 = scalar_lea.hbm %s2342_s5, 12288 }
  0x26   :  { %p2014_p2 = scmp.ne.s32.totalorder %s2342_s5, %s2013_s27  ;;  %p2017_p3 = scmp.lt.u32.totalorder %s2013_s27, %s2342_s5 }
  0x28   :  { %p2019_p4 = pnand %p2017_p3, %p2014_p2 }
  0x2a   :  { %2022 = shalt.err (!%p2019_p4)
}
  0x2b   :  { %s2023_s14 = scalar_lea.vmem %s54_s15, 12288  ;;  %p2028_p6 = scmp.lt.s32.totalorder %s54_s15, %s54_s15 }
  0x2c   :  { %p2024_p5 = scmp.ne.s32.totalorder %s54_s15, %s2023_s14  ;;  %p2029_p7 = scmp.lt.s32.totalorder %s2023_s14, %s2023_s14 }
  0x2e   :  { %p2030_p8 = por %p2029_p7, %p2028_p6 }
  0x30   :  { %p2031_p9 = pnand %p2030_p8, %p2024_p5 }
  0x32   :  { %2034 = shalt.err (!%p2031_p9)
}
  0x33   :  { %s2092_s0 = smov 192   ;;  %s2093_s13 = smov 12  }
  0x34   :  { %59 = dma.hbm_to_vmem [thread:$0]  %s2342_s5, 12288, %s54_s15, [#allocation6], %s2092_s0, %s2092_s0, %s2093_s13  }
  0x35   :  { %s2094_s19 = smov [#allocation8]   ;;  %s2035_s23 = scalar_lea.hbm %s2346_s9, 3072 }
  0x36   :  { %s71_s20 = sshll.u32 %s2094_s19, 4  ;;  %p2036_p10 = scmp.ne.s32.totalorder %s2346_s9, %s2035_s23  ;;  %s72_s20 = int_to_ptr.vmem [resolvable:$true] %s71_s20 }
  0x37   :  { %p2039_p11 = scmp.lt.u32.totalorder %s2035_s23, %s2346_s9 }
  0x39   :  { %p2041_p12 = pnand %p2039_p11, %p2036_p10 }
  0x3b   :  { %2044 = shalt.err (!%p2041_p12)
}
  0x3c   :  { %s2045_s26 = scalar_lea.vmem %s72_s20, 3072  ;;  %p2050_p0 = scmp.lt.s32.totalorder %s72_s20, %s72_s20 }
  0x3d   :  { %p2046_p13 = scmp.ne.s32.totalorder %s72_s20, %s2045_s26  ;;  %p2051_p1 = scmp.lt.s32.totalorder %s2045_s26, %s2045_s26 }
  0x3f   :  { %p2052_p2 = por %p2051_p1, %p2050_p0 }
  0x41   :  { %p2053_p3 = pnand %p2052_p2, %p2046_p13 }
  0x43   :  { %2056 = shalt.err (!%p2053_p3)
}
  0x44   :  { %s2095_s5 = smov 64   ;;  %s2096_s15 = smov 4  }
  0x45   :  { %77 = dma.hbm_to_vmem [thread:$0]  %s2346_s9, 3072, %s72_s20, [#allocation9], %s2095_s5, %s2095_s5, %s2096_s15  }
  0x46   :  { %2079 = dma.done.wait [#allocation3], 128  }
  0x47   :  { %2080 = vsyncadd [#allocation3], 4294967168 }
  0x48   :  { %2081 = dma.done.wait [#allocation6], 13312  }
  0x49   :  { %2082 = vsyncadd [#allocation6], 4294953984 }
  0x4a   :  { %2083 = dma.done.wait [#allocation9], 3072  }
  0x4b   :  { %2084 = vsyncadd [#allocation9], 4294964224  ;;  %v2097_v0 = vmov 0   ;;  %v1797_v1 = vld [vmem:[#allocation5 + $0x4] ss:$16 sps:$4 sm:$0xff]   ;;  %v93_v9 = vld [vmem:[#allocation2] sm:$0xff]  ;;  %v105_v11 = vlaneseq }
  0x4c   :  { %201 = vmatprep.mubr.bf16.mxu0 %v2097_v0  ;;  %242 = vmatprep.mubr.bf16.mxu1 %v2097_v0  ;;  %v1799_v2 = vld [vmem:[#allocation5 + $0xc] ss:$16 sps:$4 sm:$0xff]   ;;  %v1801_v3 = vld [vmem:[#allocation5] ss:$16 sps:$4 sm:$0xff]   ;;  %v1802_v4 = vld [vmem:[#allocation5 + $0x8] ss:$16 sps:$4 sm:$0xff]   ;;  %v94_v10 = vpack.c.bf16 %v93_v9, %v93_v9 }
  0x4d   :  { %169 = vmatprep.subr.bf16.mxu0 %v1797_v1  ;;  %210 = vmatprep.subr.bf16.mxu1 %v1799_v2  ;;  %v1803_v5 = vld [vmem:[#allocation5 + $0x24] ss:$16 sps:$4 sm:$0xff]   ;;  %v1805_v6 = vld [vmem:[#allocation5 + $0x2c] ss:$16 sps:$4 sm:$0xff]   ;;  %v1807_v7 = vld [vmem:[#allocation5 + $0x20] ss:$16 sps:$4 sm:$0xff]  }
  0x4e   :  { %170 = vmatpush1.bf16.msra.mxu0 %v1801_v3  ;;  %211 = vmatpush1.bf16.msra.mxu1 %v1802_v4  ;;  %v1808_v8 = vld [vmem:[#allocation5 + $0x28] ss:$16 sps:$4 sm:$0xff]   ;;  %vm165_vm0 = vcmask 261120   ;;  %v106_v12 = vshrl.u32 %v105_v11, 7  ;;  %v2220_v18 = vand.u32 127, %v105_v11  ;;  %vm2099_vm3 = vmmov 0  }
  0x4f   :  { %171 = vmatprep.subr.bf16.mxu0 %v1803_v5  ;;  %212 = vmatprep.subr.bf16.mxu1 %v1805_v6  ;;  %v103_v14 = vld [vmem:[%s2339_s2] sm:$0xf]  ;;  %v1809_v40 = vld [vmem:[#allocation7] ss:$12 sps:$4 sm:$0xff]   ;;  %v1811_v41 = vld [vmem:[#allocation7 + $0x4] ss:$12 sps:$4 sm:$0xff]  }
  0x50   :  { %v2209_v13 = vsub.s32 0, %v106_v12  ;;  %v2214_v15 = vsub.s32 2, %v106_v12  ;;  %v2216_v16 = vsub.s32 1, %v106_v12  ;;  %v2218_v17 = vsub.s32 3, %v106_v12  ;;  %v1814_v42 = vld [vmem:[#allocation7 + $0x1c] ss:$12 sps:$4 sm:$0xff]  }
  0x51   :  { %v2227_v23 = vadd.s32 384, %v2220_v18  ;;  %v1812_v43 = vld [vmem:[#allocation7 + $0x18] ss:$12 sps:$4 sm:$0xff]   ;;  %v1817_v44 = vld [vmem:[#allocation7 + $0x34] ss:$12 sps:$4 sm:$0xff]   ;;  %s2100_s17 = smov [#allocation10]  }
  0x52   :  { %172 = vmatpush1.bf16.msra.mxu0 %v1807_v7  ;;  %213 = vmatpush1.bf16.msra.mxu1 %v1808_v8  ;;  %v108_v19 = vrot.slane %v103_v14, %v2209_v13  ;;  %v116_v20 = vrot.slane %v103_v14, %v2214_v15  ;;  %v112_v21 = vrot.slane %v103_v14, %v2216_v16  ;;  %v1836_v45 = vld [vmem:[#allocation7 + $0xc8] ss:$12 sps:$4 sm:$0xff]   ;;  %v1815_v47 = vld [vmem:[#allocation7 + $0x30] ss:$12 sps:$4 sm:$0xff]   ;;  %v1841_v48 = vld [vmem:[#allocation7 + $0xe0] ss:$12 sps:$4 sm:$0xff]  }
  0x53   :  { %v120_v22 = vrot.slane %v103_v14, %v2218_v17  ;;  %vm261_vm1 = vcmp.lt.s32.totalorder %v2227_v23, 400  ;;  %1011 = vmatprep.subr.bf16.mxu0 %v1811_v41  ;;  %v1837_v46 = vld [vmem:[#allocation7 + $0x8] ss:$12 sps:$4 sm:$0xff]   ;;  %v1820_v49 = vld [vmem:[#allocation7 + $0x4c] ss:$12 sps:$4 sm:$0xff]   ;;  %1682 = vmatprep.subr.bf16.mxu1 %v1836_v45  ;;  %s1540_s19 = sshll.u32 %s2100_s17, 4  ;;  %s1541_s19 = int_to_ptr.vmem [resolvable:$true] %s1540_s19 }
  0x54   :  { %v1842_v50 = vld [vmem:[#allocation7 + $0x20] ss:$12 sps:$4 sm:$0xff]   ;;  %v1818_v51 = vld [vmem:[#allocation7 + $0x48] ss:$12 sps:$4 sm:$0xff]   ;;  %v1823_v52 = vld [vmem:[#allocation7 + $0x64] ss:$12 sps:$4 sm:$0xff]   ;;  %p2062_p5 = scmp.lt.s32.totalorder %s1541_s19, %s1541_s19 }
  0x55   :  { %1559 = vmatmul.mubr.msk.bf16.vlgmr.msra.gmra.mrb[0].mxu0 %vm165_vm0, %v94_v10  ;;  %1560 = vmatmul.mubr.msk.bf16.vlgmr.msra.gmra.mrb[0].mxu1 %vm165_vm0, %v94_v10  ;;  %v1821_v53 = vld [vmem:[#allocation7 + $0x60] ss:$12 sps:$4 sm:$0xff]   ;;  %v1826_v54 = vld [vmem:[#allocation7 + $0x7c] ss:$12 sps:$4 sm:$0xff]   ;;  %v1824_v55 = vld [vmem:[#allocation7 + $0x78] ss:$12 sps:$4 sm:$0xff]  }
  0x56   :  { %1012 = vmatpush1.bf16.msra.mxu0 %v1809_v40  ;;  %1683 = vmatpush3.bf16.msra.mxu1 %v1837_v46  ;;  %v1829_v56 = vld [vmem:[#allocation7 + $0x94] ss:$12 sps:$4 sm:$0xff]   ;;  %v1827_v57 = vld [vmem:[#allocation7 + $0x90] ss:$12 sps:$4 sm:$0xff]   ;;  %v1832_v58 = vld [vmem:[#allocation7 + $0xac] ss:$12 sps:$4 sm:$0xff]  }
  0x57   :  { %1013 = vmatprep.subr.bf16.mxu0 %v1814_v42  ;;  %1684 = vmatprep.subr.bf16.mxu1 %v1841_v48  ;;  %v1830_v59 = vld [vmem:[#allocation7 + $0xa8] ss:$12 sps:$4 sm:$0xff]   ;;  %v1835_v60 = vld [vmem:[#allocation7 + $0xc4] ss:$12 sps:$4 sm:$0xff]   ;;  %v1833_v61 = vld [vmem:[#allocation7 + $0xc0] ss:$12 sps:$4 sm:$0xff]  }
  0x58   :  { %v1840_v62 = vld [vmem:[#allocation7 + $0xdc] ss:$12 sps:$4 sm:$0xff]   ;;  %v1838_v63 = vld [vmem:[#allocation7 + $0xd8] ss:$12 sps:$4 sm:$0xff]   ;;  %s2057_s20 = scalar_lea.vmem %s1541_s19, 128 }
  0x59   :  { %v1850_v23 = vld [vmem:[#allocation7 + $0x10c] ss:$12 sps:$4 sm:$0xff]   ;;  %v1871_v40 = vld [vmem:[#allocation7 + $0x170] ss:$12 sps:$4 sm:$0xff]   ;;  %v1868_v41 = vld [vmem:[#allocation7 + $0x168] ss:$12 sps:$4 sm:$0xff]   ;;  %p2058_p4 = scmp.ne.s32.totalorder %s1541_s19, %s2057_s20  ;;  %p2063_p6 = scmp.lt.s32.totalorder %s2057_s20, %s2057_s20 }
  0x5a   :  { %1014 = vmatpush1.bf16.msra.mxu0 %v1812_v43  ;;  %1685 = vmatpush3.bf16.msra.mxu1 %v1842_v50  ;;  %v1872_v42 = vld [vmem:[#allocation7 + $0xb0] ss:$12 sps:$4 sm:$0xff]   ;;  %v2269_v48 = vld [vmem:[%s2340_s3] sm:$0xf] }
  0x5b   :  { %1015 = vmatprep.subr.bf16.mxu0 %v1817_v44  ;;  %v1875_v43 = vld [vmem:[#allocation7 + $0x184] ss:$12 sps:$4 sm:$0xff]   ;;  %v1876_v44 = vld [vmem:[#allocation7 + $0x248] ss:$12 sps:$4 sm:$0xff]   ;;  %v304_v50 = vrot.slane %v2269_v48, %v2216_v16  ;;  %p2064_p7 = por %p2063_p6, %p2062_p5 }
  0x5d   :  { %p2065_p8 = pnand %p2064_p7, %p2058_p4 }
  0x5e   :  { %1016 = vmatpush1.bf16.msra.mxu0 %v1815_v47 }
  0x5f   :  { %1017 = vmatprep.subr.bf16.mxu0 %v1820_v49  ;;  %v2274_v49 = vld [vmem:[%s2341_s4] sm:$0xf] }
  0x62   :  { %1018 = vmatpush1.bf16.msra.mxu0 %v1818_v51  ;;  %v300_v51 = vrot.slane %v2269_v48, %v2209_v13 }
  0x63   :  { %1019 = vmatprep.subr.bf16.mxu0 %v1823_v52  ;;  %v312_v52 = vrot.slane %v2269_v48, %v2218_v17 }
  0x66   :  { %1020 = vmatpush1.bf16.msra.mxu0 %v1821_v53 }
  0x67   :  { %1021 = vmatprep.subr.bf16.mxu0 %v1826_v54  ;;  %v329_v54 = vrot.slane %v2274_v49, %v2216_v16 }
  0x6a   :  { %1022 = vmatpush1.bf16.msra.mxu0 %v1824_v55  ;;  %v325_v55 = vrot.slane %v2274_v49, %v2209_v13 }
  0x6b   :  { %1023 = vmatprep.subr.bf16.mxu0 %v1829_v56 }
  0x6e   :  { %1024 = vmatpush1.bf16.msra.mxu0 %v1827_v57 }
  0x6f   :  { %1025 = vmatprep.subr.bf16.mxu0 %v1832_v58 }
  0x72   :  { %1026 = vmatpush1.bf16.msra.mxu0 %v1830_v59  ;;  %v337_v59 = vrot.slane %v2274_v49, %v2218_v17 }
  0x73   :  { %1027 = vmatprep.subr.bf16.mxu0 %v1835_v60 }
  0x76   :  { %1028 = vmatpush1.bf16.msra.mxu0 %v1833_v61 }
  0x77   :  { %1029 = vmatprep.subr.bf16.mxu0 %v1840_v62 }
  0x7a   :  { %1030 = vmatpush1.bf16.msra.mxu0 %v1838_v63 }
 0x128   :  { %v203_v24 = vpop.f32.mrb[0].mxu0  ;;  %v244_v25 = vpop.f32.mrb[0].mxu1 }
 0x129   :  { %v2229_v26 = vadd.f32 %v203_v24, %v108_v19  ;;  %v205_v27 = vpop.f32.mrb[1].mxu0  ;;  %v246_v28 = vpop.f32.mrb[1].mxu1  ;;  %v2231_v29 = vadd.f32 %v244_v25, %v116_v20  ;;  %v1845_v19 = vld [vmem:[#allocation7 + $0xf4] ss:$12 sps:$4 sm:$0xff]   ;;  %v1846_v20 = vld [vmem:[#allocation7 + $0xf8] ss:$12 sps:$4 sm:$0xff]  }
 0x12a   :  { %v2233_v30 = vadd.f32 %v205_v27, %v112_v21  ;;  %v2235_v31 = vadd.f32 %v246_v28, %v120_v22  ;;  %v207_v32 = vpop.f32.mrb[2].mxu0  ;;  %v248_v33 = vpop.f32.mrb[2].mxu1  ;;  %v1843_v21 = vld [vmem:[#allocation7 + $0xf0] ss:$12 sps:$4 sm:$0xff]   ;;  %v1847_v22 = vld [vmem:[#allocation7 + $0x38] ss:$12 sps:$4 sm:$0xff]   ;;  %1031 = vmatprep.subr.bf16.mxu0 %v1845_v19  ;;  %1686 = vmatprep.subr.bf16.mxu1 %v1846_v20 }
 0x12b   :  { %v208_v34 = vpop.f32.mrb[3].mxu0  ;;  %v249_v35 = vpop.f32.mrb[3].mxu1  ;;  %1032 = vmatpush1.bf16.msra.mxu0 %v1843_v21  ;;  %1687 = vmatpush3.bf16.msra.mxu1 %v1847_v22  ;;  %v1851_v24 = vld [vmem:[#allocation7 + $0x110] ss:$12 sps:$4 sm:$0xff]   ;;  %v1848_v25 = vld [vmem:[#allocation7 + $0x108] ss:$12 sps:$4 sm:$0xff]  }
 0x12c   :  { %v266_v36 = vadd.f32 %v2233_v30, %v2229_v26  ;;  %v265_v37 = vsel %vm261_vm1, %v2235_v31, 0.0  ;;  %1033 = vmatprep.subr.bf16.mxu0 %v1850_v23  ;;  %1688 = vmatprep.subr.bf16.mxu1 %v1851_v24  ;;  %v1855_v27 = vld [vmem:[#allocation7 + $0x124] ss:$12 sps:$4 sm:$0xff]   ;;  %v1856_v28 = vld [vmem:[#allocation7 + $0x128] ss:$12 sps:$4 sm:$0xff]  }
 0x12d   :  { %v1861_v32 = vld [vmem:[#allocation7 + $0x140] ss:$12 sps:$4 sm:$0xff]   ;;  %v1858_v33 = vld [vmem:[#allocation7 + $0x138] ss:$12 sps:$4 sm:$0xff]   ;;  %v1883_v21 = vld [vmem:[#allocation7 + $0x1b0] ss:$12 sps:$4 sm:$0xff]  }
 0x12e   :  { %v267_v38 = vadd.f32 %v266_v36, %v2231_v29  ;;  %v1862_v34 = vld [vmem:[#allocation7 + $0x80] ss:$12 sps:$4 sm:$0xff]   ;;  %v1866_v36 = vld [vmem:[#allocation7 + $0x158] ss:$12 sps:$4 sm:$0xff]   ;;  %v1891_v24 = vld [vmem:[#allocation7 + $0x290] ss:$12 sps:$4 sm:$0xff]  }
 0x12f   :  { %1034 = vmatpush1.bf16.msra.mxu0 %v1848_v25  ;;  %v1865_v35 = vld [vmem:[#allocation7 + $0x154] ss:$12 sps:$4 sm:$0xff]   ;;  %v1886_v20 = vld [vmem:[#allocation7 + $0x278] ss:$12 sps:$4 sm:$0xff]  }
 0x130   :  { %v268_v39 = vadd.f32 %v267_v38, %v265_v37  ;;  %1035 = vmatprep.subr.bf16.mxu0 %v1855_v27  ;;  %v1863_v37 = vld [vmem:[#allocation7 + $0x150] ss:$12 sps:$4 sm:$0xff]   ;;  %v1867_v38 = vld [vmem:[#allocation7 + $0x98] ss:$12 sps:$4 sm:$0xff]   ;;  %v1885_v19 = vld [vmem:[#allocation7 + $0x1b4] ss:$12 sps:$4 sm:$0xff]  }
 0x131   :  { %v1887_v22 = vld [vmem:[#allocation7 + $0x1b8] ss:$12 sps:$4 sm:$0xff]   ;;  %v1888_v25 = vld [vmem:[#allocation7 + $0x1c8] ss:$12 sps:$4 sm:$0xff]  }
 0x132   :  { %269 = vadd.xlane.f32.xlu0 %v268_v39  ;;  %v1870_v39 = vld [vmem:[#allocation7 + $0x16c] ss:$12 sps:$4 sm:$0xff]   ;;  %v1895_v27 = vld [vmem:[#allocation7 + $0x1e4] ss:$12 sps:$4 sm:$0xff]  }
 0x133   :  { %v1890_v23 = vld [vmem:[#allocation7 + $0x1cc] ss:$12 sps:$4 sm:$0xff]  }
 0x1bf   :  { %v270_v0 = vpop.xlane.xlu0 %269 }
 0x1c0   :  { %v271_v1 = vmul.f32 0.0025, %v270_v0 }
 0x1c2   :  { %v2245_v2 = vsub.f32 %v2229_v26, %v271_v1  ;;  %v2248_v3 = vsub.f32 %v2233_v30, %v271_v1  ;;  %v2251_v4 = vsub.f32 %v2231_v29, %v271_v1  ;;  %v275_v5 = vsub.f32 %v2235_v31, %v271_v1  ;;  %v1852_v26 = vld [vmem:[#allocation7 + $0x50] ss:$12 sps:$4 sm:$0xff]   ;;  %v1853_v29 = vld [vmem:[#allocation7 + $0x120] ss:$12 sps:$4 sm:$0xff]   ;;  %v1857_v30 = vld [vmem:[#allocation7 + $0x68] ss:$12 sps:$4 sm:$0xff]  }
 0x1c3   :  { %1689 = vmatpush3.bf16.msra.mxu1 %v1852_v26  ;;  %v1860_v31 = vld [vmem:[#allocation7 + $0x13c] ss:$12 sps:$4 sm:$0xff]   ;;  %1036 = vmatpush1.bf16.msra.mxu0 %v1853_v29  ;;  %v1893_v29 = vld [vmem:[#allocation7 + $0x1e0] ss:$12 sps:$4 sm:$0xff]  }
 0x1c4   :  { %v280_v6 = vmul.f32 %v2245_v2, %v2245_v2  ;;  %v281_v7 = vmul.f32 %v2248_v3, %v2248_v3  ;;  %v2260_v8 = vsel %vm261_vm1, %v275_v5, 0.0  ;;  %v282_v9 = vmul.f32 %v2251_v4, %v2251_v4  ;;  %1690 = vmatprep.subr.bf16.mxu1 %v1856_v28  ;;  %1037 = vmatprep.subr.bf16.mxu0 %v1860_v31  ;;  %v1892_v26 = vld [vmem:[#allocation7 + $0x1d0] ss:$12 sps:$4 sm:$0xff]   ;;  %v1896_v28 = vld [vmem:[#allocation7 + $0x2a8] ss:$12 sps:$4 sm:$0xff]  }
 0x1c5   :  { %v283_v11 = vmul.f32 %v2260_v8, %v2260_v8  ;;  %v1900_v31 = vld [vmem:[#allocation7 + $0x1fc] ss:$12 sps:$4 sm:$0xff]  }
 0x1c6   :  { %v284_v10 = vadd.f32 %v281_v7, %v280_v6 }
 0x1c7   :  { %1691 = vmatpush3.bf16.msra.mxu1 %v1857_v30  ;;  %1038 = vmatpush1.bf16.msra.mxu0 %v1858_v33  ;;  %v1897_v30 = vld [vmem:[#allocation7 + $0x1e8] ss:$12 sps:$4 sm:$0xff]  }
 0x1c8   :  { %v285_v12 = vadd.f32 %v284_v10, %v282_v9  ;;  %1692 = vmatprep.subr.bf16.mxu1 %v1861_v32  ;;  %1039 = vmatprep.subr.bf16.mxu0 %v1865_v35  ;;  %v1873_v10 = vld [vmem:[#allocation7 + $0x180] ss:$12 sps:$4 sm:$0xff]   ;;  %v1898_v35 = vld [vmem:[#allocation7 + $0x1f8] ss:$12 sps:$4 sm:$0xff]  }
 0x1c9   :  { %v1901_v32 = vld [vmem:[#allocation7 + $0x2c0] ss:$12 sps:$4 sm:$0xff]  }
 0x1ca   :  { %v286_v14 = vadd.f32 %v285_v12, %v283_v11  ;;  %v1878_v12 = vld [vmem:[#allocation7 + $0x198] ss:$12 sps:$4 sm:$0xff]  }
 0x1cb   :  { %1693 = vmatpush3.bf16.msra.mxu1 %v1862_v34  ;;  %1040 = vmatpush1.bf16.msra.mxu0 %v1863_v37  ;;  %v308_v34 = vrot.slane %v2269_v48, %v2214_v15  ;;  %v1905_v37 = vld [vmem:[#allocation7 + $0x214] ss:$12 sps:$4 sm:$0xff]  }
 0x1cc   :  { %287 = vadd.xlane.f32.xlu0 %v286_v14  ;;  %1694 = vmatprep.subr.bf16.mxu1 %v1866_v36  ;;  %v1882_v14 = vld [vmem:[#allocation7 + $0x1a0] ss:$12 sps:$4 sm:$0xff]  }
 0x1cd   :  { %1041 = vmatprep.subr.bf16.mxu0 %v1870_v39  ;;  %v1902_v36 = vld [vmem:[#allocation7 + $0x200] ss:$12 sps:$4 sm:$0xff]  }
 0x1cf   :  { %1695 = vmatpush3.bf16.msra.mxu1 %v1867_v38  ;;  %1042 = vmatpush1.bf16.msra.mxu0 %v1868_v41  ;;  %v1906_v38 = vld [vmem:[#allocation7 + $0x2d8] ss:$12 sps:$4 sm:$0xff]   ;;  %v1903_v41 = vld [vmem:[#allocation7 + $0x210] ss:$12 sps:$4 sm:$0xff]  }
 0x1d0   :  { %1696 = vmatprep.subr.bf16.mxu1 %v1871_v40  ;;  %1052 = vmatprep.subr.bf16.mxu0 %v1875_v43  ;;  %v333_v40 = vrot.slane %v2274_v49, %v2214_v15  ;;  %v1911_v43 = vld [vmem:[#allocation7 + $0x2f0] ss:$12 sps:$4 sm:$0xff]   ;;  %v1913_v49 = vld [vmem:[#allocation7 + $0x240] ss:$12 sps:$4 sm:$0xff]  }
 0x1d3   :  { %1697 = vmatpush3.bf16.msra.mxu1 %v1872_v42  ;;  %v1907_v42 = vld [vmem:[#allocation7 + $0x218] ss:$12 sps:$4 sm:$0xff]  }
 0x1d4   :  { %1704 = vmatprep.subr.bf16.mxu1 %v1876_v44 }
 0x259   :  { %v288_v45 = vpop.xlane.xlu0 %287 }
 0x25a   :  { %v289_v46 = vmul.f32 0.0025, %v288_v45  ;;  %v1908_v45 = vld [vmem:[#allocation7 + $0x228] ss:$12 sps:$4 sm:$0xff]  }
 0x25c   :  { %v290_v47 = vadd.f32 1e-05, %v289_v46  ;;  %v1912_v46 = vld [vmem:[#allocation7 + $0x230] ss:$12 sps:$4 sm:$0xff]  }
 0x25e   :  { %1961 = vrsqrt.f32 %v290_v47  ;;  %v1915_v47 = vld [vmem:[#allocation7 + $0x244] ss:$12 sps:$4 sm:$0xff]  }
 0x268   :  { %v1962_v53 = vpop.eup %1961 }
 0x269   :  { %v293_v56 = vmul.f32 %v1962_v53, %v2248_v3  ;;  %v292_v57 = vmul.f32 %v1962_v53, %v2245_v2  ;;  %v295_v58 = vmul.f32 %v1962_v53, %v2260_v8  ;;  %v1877_v3 = vld [vmem:[#allocation7 + $0x188] ss:$12 sps:$4 sm:$0xff]   ;;  %v1881_v8 = vld [vmem:[#allocation7 + $0x260] ss:$12 sps:$4 sm:$0xff]   ;;  %v294_v33 = vmul.f32 %v1962_v53, %v2251_v4 }
 0x26a   :  { %v1880_v2 = vld [vmem:[#allocation7 + $0x19c] ss:$12 sps:$4 sm:$0xff]   ;;  %v1910_v4 = vld [vmem:[#allocation7 + $0x22c] ss:$12 sps:$4 sm:$0xff]   ;;  %v1921_v53 = vld [vmem:[#allocation7 + $0x274] ss:$12 sps:$4 sm:$0xff]  }
 0x26b   :  { %v318_v60 = vmul.f32 %v304_v50, %v293_v56  ;;  %v317_v61 = vmul.f32 %v300_v51, %v292_v57  ;;  %v320_v62 = vmul.f32 %v312_v52, %v295_v58  ;;  %v319_v39 = vmul.f32 %v308_v34, %v294_v33  ;;  %v1918_v51 = vld [vmem:[#allocation7 + $0x25c] ss:$12 sps:$4 sm:$0xff]   ;;  %v1916_v52 = vld [vmem:[#allocation7 + $0x258] ss:$12 sps:$4 sm:$0xff]   ;;  %v1925_v58 = vld [vmem:[#allocation7 + $0x2a0] ss:$12 sps:$4 sm:$0xff]  }
 0x26c   :  { %v1922_v56 = vld [vmem:[#allocation7 + $0x288] ss:$12 sps:$4 sm:$0xff]   ;;  %v1927_v57 = vld [vmem:[#allocation7 + $0x2a4] ss:$12 sps:$4 sm:$0xff]  }
 0x26d   :  { %v343_v63 = vadd.f32 %v329_v54, %v318_v60  ;;  %v342_v0 = vadd.f32 %v325_v55, %v317_v61  ;;  %v345_v1 = vadd.f32 %v337_v59, %v320_v62  ;;  %v344_v44 = vadd.f32 %v333_v40, %v319_v39  ;;  %v1919_v54 = vld [vmem:[#allocation7 + $0x270] ss:$12 sps:$4 sm:$0xff]   ;;  %v1924_v55 = vld [vmem:[#allocation7 + $0x28c] ss:$12 sps:$4 sm:$0xff]   ;;  %v1933_v61 = vld [vmem:[#allocation7 + $0x2d4] ss:$12 sps:$4 sm:$0xff]  }
 0x26e   :  { %v1930_v59 = vld [vmem:[#allocation7 + $0x2bc] ss:$12 sps:$4 sm:$0xff]   ;;  %v1928_v60 = vld [vmem:[#allocation7 + $0x2b8] ss:$12 sps:$4 sm:$0xff]  }
 0x26f   :  { %v347_v5 = vmax.f32 %v343_v63, 0.0  ;;  %v346_v6 = vmax.f32 %v342_v0, 0.0  ;;  %v349_v7 = vmax.f32 %v345_v1, 0.0  ;;  %v348_v48 = vmax.f32 %v344_v44, 0.0  ;;  %v1931_v62 = vld [vmem:[#allocation7 + $0x2d0] ss:$12 sps:$4 sm:$0xff]  }
 0x270   :  { %v1936_v63 = vld [vmem:[#allocation7 + $0x2ec] ss:$12 sps:$4 sm:$0xff]   ;;  %v1934_v0 = vld [vmem:[#allocation7 + $0x2e8] ss:$12 sps:$4 sm:$0xff]   ;;  %v1938_v33 = vld [vmem:[#allocation8] sm:$0xff]  }
 0x271   :  { %v351_v9 = vpack.c.bf16 %v347_v5, %v347_v5  ;;  %v350_v11 = vpack.c.bf16 %v346_v6, %v346_v6  ;;  %v353_v17 = vpack.c.bf16 %v349_v7, %v349_v7  ;;  %v352_v50 = vpack.c.bf16 %v348_v48, %v348_v48  ;;  %v1939_v34 = vld [vmem:[#allocation8 + $0x48] sm:$0xff]   ;;  %v1944_v48 = vld [vmem:[#allocation8 + $0x18] sm:$0xff]  }
 0x273   :  { %1043 = vmatprep.mubr.bf16.mxu0 %v351_v9  ;;  %1125 = vmatprep.mubr.bf16.mxu1 %v351_v9 }
 0x274   :  { %1044 = vmatmul.mubr.bf16.vlgmr.msra.gmra.mrb[4].mxu0 %v350_v11  ;;  %1126 = vmatmul.mubr.bf16.vlgmr.msra.gmra.mrb[4].mxu1 %v350_v11 }
 0x275   :  { %1053 = vmatpush1.bf16.msra.mxu0 %v1873_v10  ;;  %1705 = vmatpush3.bf16.msra.mxu1 %v1877_v3  ;;  %v482_v10 = vld [vmem:[%s2343_s6] sm:$0x7] }
 0x276   :  { %1084 = vmatprep.mubr.bf16.mxu0 %v353_v17  ;;  %1165 = vmatprep.mubr.bf16.mxu1 %v353_v17  ;;  %v495_v11 = vrot.slane %v482_v10, %v2214_v15 }
 0x277   :  { %1054 = vmatprep.subr.bf16.mxu0 %v1880_v2  ;;  %1706 = vmatprep.subr.bf16.mxu1 %v1881_v8 }
 0x279   :  { %1055 = vmatpush1.bf16.msra.mxu0 %v1878_v12  ;;  %1707 = vmatpush3.bf16.msra.mxu1 %v1882_v14 }
 0x27a   :  { %1056 = vmatprep.subr.bf16.mxu0 %v1885_v19  ;;  %1708 = vmatprep.subr.bf16.mxu1 %v1886_v20  ;;  %v487_v20 = vrot.slane %v482_v10, %v2209_v13 }
 0x27d   :  { %1057 = vmatpush1.bf16.msra.mxu0 %v1883_v21  ;;  %1709 = vmatpush3.bf16.msra.mxu1 %v1887_v22  ;;  %v491_v21 = vrot.slane %v482_v10, %v2216_v16  ;;  %v256_v22 = vadd.s32 256, %v2220_v18 }
 0x27e   :  { %1058 = vmatprep.subr.bf16.mxu0 %v1890_v23  ;;  %1710 = vmatprep.subr.bf16.mxu1 %v1891_v24 }
 0x27f   :  { %vm1177_vm2 = vcmp.lt.s32.totalorder %v256_v22, 300 }
 0x281   :  { %1059 = vmatpush1.bf16.msra.mxu0 %v1888_v25  ;;  %1711 = vmatpush3.bf16.msra.mxu1 %v1892_v26 }
 0x282   :  { %1060 = vmatprep.subr.bf16.mxu0 %v1895_v27  ;;  %1712 = vmatprep.subr.bf16.mxu1 %v1896_v28 }
 0x285   :  { %1061 = vmatpush1.bf16.msra.mxu0 %v1893_v29  ;;  %1713 = vmatpush3.bf16.msra.mxu1 %v1897_v30 }
 0x286   :  { %1062 = vmatprep.subr.bf16.mxu0 %v1900_v31  ;;  %1714 = vmatprep.subr.bf16.mxu1 %v1901_v32  ;;  %v1937_v32 = vld [vmem:[#allocation8 + $0x40] sm:$0xff]  }
 0x289   :  { %1063 = vmatpush1.bf16.msra.mxu0 %v1898_v35  ;;  %1715 = vmatpush3.bf16.msra.mxu1 %v1902_v36  ;;  %v1940_v35 = vld [vmem:[#allocation8 + $0x8] sm:$0xff]  }
 0x28a   :  { %1064 = vmatprep.subr.bf16.mxu0 %v1905_v37  ;;  %1716 = vmatprep.subr.bf16.mxu1 %v1906_v38 }
 0x28d   :  { %1065 = vmatpush1.bf16.msra.mxu0 %v1903_v41  ;;  %1717 = vmatpush3.bf16.msra.mxu1 %v1907_v42 }
 0x28e   :  { %1066 = vmatprep.subr.bf16.mxu0 %v1910_v4  ;;  %1718 = vmatprep.subr.bf16.mxu1 %v1911_v43 }
 0x291   :  { %1067 = vmatpush1.bf16.msra.mxu0 %v1908_v45  ;;  %1719 = vmatpush3.bf16.msra.mxu1 %v1912_v46  ;;  %v1941_v45 = vld [vmem:[#allocation8 + $0x50] sm:$0xff]  }
 0x292   :  { %1068 = vmatprep.subr.bf16.mxu0 %v1915_v47  ;;  %1726 = vmatprep.subr.bf16.mxu1 %v1937_v32  ;;  %v1942_v46 = vld [vmem:[#allocation8 + $0x10] sm:$0xff]   ;;  %v1943_v47 = vld [vmem:[#allocation8 + $0x58] sm:$0xff]  }
 0x294   :  { %1166 = vmatmul.mubr.bf16.vlgmr.msra.gmra.mrb[8].mxu1 %v352_v50 }
 0x295   :  { %1069 = vmatpush1.bf16.msra.mxu0 %v1913_v49  ;;  %1727 = vmatpush3.bf16.msra.mxu1 %v1938_v33  ;;  %v1945_v49 = vld [vmem:[#allocation8 + $0x60] sm:$0xff]  }
 0x296   :  { %1070 = vmatprep.subr.bf16.mxu0 %v1918_v51  ;;  %1728 = vmatprep.subr.bf16.mxu1 %v1939_v34  ;;  %v1947_v51 = vld [vmem:[#allocation8 + $0x68] sm:$0xff]  }
 0x299   :  { %1071 = vmatpush1.bf16.msra.mxu0 %v1916_v52  ;;  %1729 = vmatpush3.bf16.msra.mxu1 %v1940_v35  ;;  %v1948_v52 = vld [vmem:[#allocation8 + $0x28] sm:$0xff]  }
 0x29a   :  { %1072 = vmatprep.subr.bf16.mxu0 %v1921_v53  ;;  %1730 = vmatprep.subr.bf16.mxu1 %v1941_v45  ;;  %v1949_v53 = vld [vmem:[#allocation8 + $0x70] sm:$0xff]  }
 0x29d   :  { %1073 = vmatpush1.bf16.msra.mxu0 %v1919_v54  ;;  %1731 = vmatpush3.bf16.msra.mxu1 %v1942_v46  ;;  %v1950_v54 = vld [vmem:[#allocation8 + $0x30] sm:$0xff]  }
 0x29e   :  { %1074 = vmatprep.subr.bf16.mxu0 %v1924_v55  ;;  %1732 = vmatprep.subr.bf16.mxu1 %v1943_v47  ;;  %v1951_v55 = vld [vmem:[#allocation8 + $0x78] sm:$0xff]  }
 0x2a1   :  { %1075 = vmatpush1.bf16.msra.mxu0 %v1922_v56  ;;  %1733 = vmatpush3.bf16.msra.mxu1 %v1944_v48  ;;  %v1952_v56 = vld [vmem:[#allocation8 + $0x38] sm:$0xff]  }
 0x2a2   :  { %1076 = vmatprep.subr.bf16.mxu0 %v1927_v57  ;;  %1734 = vmatprep.subr.bf16.mxu1 %v1945_v49  ;;  %v2098_v57 = vmov 0.0  }
 0x2a5   :  { %1077 = vmatpush1.bf16.msra.mxu0 %v1925_v58 }
 0x2a6   :  { %1078 = vmatprep.subr.bf16.mxu0 %v1930_v59 }
 0x2a9   :  { %1079 = vmatpush1.bf16.msra.mxu0 %v1928_v60 }
 0x2aa   :  { %1080 = vmatprep.subr.bf16.mxu0 %v1933_v61  ;;  %v1173_v61 = vld [vmem:[%s2344_s7] sm:$0x7] }
 0x2ad   :  { %1081 = vmatpush1.bf16.msra.mxu0 %v1931_v62  ;;  %v1174_v62 = vld [vmem:[%s2345_s8] sm:$0x7] }
 0x2ae   :  { %1082 = vmatprep.subr.bf16.mxu0 %v1936_v63  ;;  %v1213_v63 = vrot.slane %v1173_v61, %v2216_v16 }
 0x2b1   :  { %1083 = vmatpush1.bf16.msra.mxu0 %v1934_v0  ;;  %v1209_v0 = vrot.slane %v1173_v61, %v2209_v13 }
 0x2b4   :  { %1085 = vmatmul.mubr.bf16.vlgmr.msra.gmra.mrb[4].mxu0 %v352_v50  ;;  %v1946_v50 = vld [vmem:[#allocation8 + $0x20] sm:$0xff]  }
 0x2b5   :  { %1735 = vmatpush3.bf16.msra.mxu1 %v1946_v50 }
 0x2b6   :  { %1736 = vmatprep.subr.bf16.mxu1 %v1947_v51 }
 0x2b9   :  { %1737 = vmatpush3.bf16.msra.mxu1 %v1948_v52 }
 0x2ba   :  { %1738 = vmatprep.subr.bf16.mxu1 %v1949_v53 }
 0x2bd   :  { %1739 = vmatpush3.bf16.msra.mxu1 %v1950_v54 }
 0x2be   :  { %1740 = vmatprep.subr.bf16.mxu1 %v1951_v55 }
 0x2c1   :  { %1741 = vmatpush3.bf16.msra.mxu1 %v1952_v56 }
 0x2c2   :  { %1757 = vmatprep.subr.bf16.mxu1 %v2098_v57 }
 0x347   :  { %v1698_v1 = vpop.f32.mrb[4].mxu1 }
 0x348   :  { %v1699_v5 = vpop.f32.mrb[5].mxu1 }
 0x349   :  { %v1700_v6 = vadd.f32 %v1699_v5, %v1698_v1  ;;  %v1701_v7 = vpop.f32.mrb[6].mxu1 }
 0x34a   :  { %v1702_v9 = vpop.f32.mrb[7].mxu1 }
 0x34b   :  { %v1128_v8 = vadd.f32 %v1700_v6, %v495_v11  ;;  %v1232_v6 = vrot.slane %v1174_v62, %v2216_v16  ;;  %v1228_v9 = vrot.slane %v1174_v62, %v2209_v13  ;;  %v1955_v16 = vld [vmem:[#allocation8 + $0x90] sm:$0xff]   ;;  %v1956_v13 = vld [vmem:[#allocation8 + $0x98] sm:$0xff]  }
 0x367   :  { %v1720_v3 = vpop.f32.mrb[8].mxu1 }
 0x368   :  { %v1721_v2 = vpop.f32.mrb[9].mxu1 }
 0x369   :  { %v1722_v17 = vadd.f32 %v1721_v2, %v1720_v3  ;;  %v1723_v12 = vpop.f32.mrb[10].mxu1 }
 0x36a   :  { %v1724_v14 = vpop.f32.mrb[11].mxu1 }
 0x36b   :  { %v1168_v19 = vadd.f32 %v1722_v17, %v1128_v8 }
 0x36d   :  { %v1180_v30 = vsel %vm1177_vm2, %v1168_v19, 0.0 }
 0x387   :  { %v1086_v23 = vpop.f32.mrb[4].mxu0 }
 0x388   :  { %v1777_v24 = vadd.f32 %v1086_v23, %v487_v20  ;;  %v1088_v25 = vpop.f32.mrb[5].mxu0  ;;  %v1954_v20 = vld [vmem:[#allocation8 + $0x88] sm:$0xff]   ;;  %v1217_v23 = vrot.slane %v1173_v61, %v2214_v15 }
 0x389   :  { %v1778_v26 = vadd.f32 %v1088_v25, %v491_v21  ;;  %v1090_v27 = vpop.f32.mrb[6].mxu0  ;;  %v1957_v21 = vld [vmem:[#allocation8 + $0xa0] sm:$0xff]  }
 0x38a   :  { %v1091_v28 = vpop.f32.mrb[7].mxu0  ;;  %v1959_v27 = vld [vmem:[#allocation8 + $0xb0] sm:$0xff]  }
 0x38b   :  { %v1181_v29 = vadd.f32 %v1778_v26, %v1777_v24 }
 0x38d   :  { %v1182_v31 = vadd.f32 %v1181_v29, %v1180_v30  ;;  %v1960_v29 = vld [vmem:[#allocation8 + $0xb8] sm:$0xff]  }
 0x38f   :  { %1183 = vadd.xlane.f32.xlu1 %v1182_v31 }
 0x41c   :  { %v1184_v18 = vpop.xlane.xlu1 %1183 }
 0x41d   :  { %v1185_v36 = vmul.f32 0.0033333334, %v1184_v18 }
 0x41f   :  { %v1186_v37 = vsub.f32 %v1777_v24, %v1185_v36  ;;  %v1187_v38 = vsub.f32 %v1778_v26, %v1185_v36  ;;  %v1188_v39 = vsub.f32 %v1168_v19, %v1185_v36  ;;  %v1953_v19 = vld [vmem:[#allocation8 + $0x80] sm:$0xff]   ;;  %v1958_v24 = vld [vmem:[#allocation8 + $0xa8] sm:$0xff]   ;;  %v1236_v26 = vrot.slane %v1174_v62, %v2214_v15  ;;  %v1657_v15 = vld [vmem:[%s2347_s10] ss:$0 sm:$0xff] }
 0x421   :  { %v2305_v40 = vsel %vm1177_vm2, %v1188_v39, 0.0  ;;  %v1192_v41 = vmul.f32 %v1186_v37, %v1186_v37  ;;  %v1193_v42 = vmul.f32 %v1187_v38, %v1187_v38 }
 0x422   :  { %v1194_v4 = vmul.f32 %v2305_v40, %v2305_v40 }
 0x423   :  { %v1195_v43 = vadd.f32 %v1193_v42, %v1192_v41 }
 0x425   :  { %v1196_v44 = vadd.f32 %v1195_v43, %v1194_v4 }
 0x427   :  { %1197 = vadd.xlane.f32.xlu1 %v1196_v44 }
 0x4b4   :  { %v1198_v58 = vpop.xlane.xlu1 %1197 }
 0x4b5   :  { %v1199_v59 = vmul.f32 0.0033333334, %v1198_v58 }
 0x4b7   :  { %v1200_v60 = vadd.f32 1e-05, %v1199_v59 }
 0x4b9   :  { %1963 = vrsqrt.f32 %v1200_v60 }
 0x4c3   :  { %v1964_v1 = vpop.eup %1963 }
 0x4c4   :  { %v1203_v5 = vmul.f32 %v1964_v1, %v1187_v38  ;;  %v1202_v7 = vmul.f32 %v1964_v1, %v1186_v37  ;;  %v1204_v22 = vmul.f32 %v1964_v1, %v2305_v40 }
 0x4c6   :  { %v1222_v10 = vmul.f32 %v1213_v63, %v1203_v5  ;;  %v1221_v11 = vmul.f32 %v1209_v0, %v1202_v7  ;;  %v1223_v25 = vmul.f32 %v1217_v23, %v1204_v22 }
 0x4c8   :  { %v1241_v3 = vadd.f32 %v1232_v6, %v1222_v10  ;;  %v1240_v2 = vadd.f32 %v1228_v9, %v1221_v11  ;;  %v1242_v28 = vadd.f32 %v1236_v26, %v1223_v25 }
 0x4ca   :  { %v1244_v8 = vmax.f32 %v1241_v3, 0.0  ;;  %v1243_v17 = vmax.f32 %v1240_v2, 0.0  ;;  %v1245_v30 = vmax.f32 %v1242_v28, 0.0 }
 0x4cc   :  { %v1247_v12 = vpack.c.bf16 %v1244_v8, %v1244_v8  ;;  %v1246_v14 = vpack.c.bf16 %v1243_v17, %v1243_v17  ;;  %v1248_v31 = vpack.c.bf16 %v1245_v30, %v1245_v30 }
 0x4ce   :  { %1480 = vmatprep.mubr.bf16.mxu1 %v1247_v12 }
 0x4cf   :  { %1481 = vmatmul.mubr.bf16.vlgmr.msra.gmra.mrb[12].mxu1 %v1246_v14 }
 0x4d0   :  { %1758 = vmatpush3.bf16.msra.mxu1 %v1953_v19  ;;  %1773 = vmatprep.mubr.msk.bf16.mxu1 %vm2099_vm3, %v2098_v57 }
 0x4d1   :  { %1759 = vmatprep.subr.bf16.mxu1 %v2098_v57 }
 0x4d4   :  { %1760 = vmatpush3.bf16.msra.mxu1 %v1954_v20 }
 0x4d5   :  { %1761 = vmatprep.subr.bf16.mxu1 %v2098_v57 }
 0x4d8   :  { %1762 = vmatpush3.bf16.msra.mxu1 %v1955_v16 }
 0x4d9   :  { %1763 = vmatprep.subr.bf16.mxu1 %v2098_v57 }
 0x4dc   :  { %1764 = vmatpush3.bf16.msra.mxu1 %v1956_v13 }
 0x4dd   :  { %1765 = vmatprep.subr.bf16.mxu1 %v2098_v57 }
 0x4e0   :  { %1766 = vmatpush3.bf16.msra.mxu1 %v1957_v21 }
 0x4e1   :  { %1767 = vmatprep.subr.bf16.mxu1 %v2098_v57 }
 0x4e4   :  { %1768 = vmatpush3.bf16.msra.mxu1 %v1958_v24 }
 0x4e5   :  { %1769 = vmatprep.subr.bf16.mxu1 %v2098_v57 }
 0x4e8   :  { %1770 = vmatpush3.bf16.msra.mxu1 %v1959_v27 }
 0x4e9   :  { %1771 = vmatprep.subr.bf16.mxu1 %v2098_v57 }
 0x4ec   :  { %1772 = vmatpush3.bf16.msra.mxu1 %v1960_v29 }
 0x4ef   :  { %1774 = vmatmul.mubr.bf16.vlgmr.msra.gmra.mrb[16].mxu1 %v1248_v31 }
 0x5a2   :  { %v1742_v32 = vpop.f32.mrb[12].mxu1 }
 0x5a3   :  { %v1743_v33 = vpop.f32.mrb[13].mxu1 }
 0x5a4   :  { %v1744_v34 = vadd.f32 %v1743_v33, %v1742_v32  ;;  %v1745_v35 = vpop.f32.mrb[14].mxu1 }
 0x5a5   :  { %v1746_v18 = vpop.f32.mrb[15].mxu1 }
 0x5a6   :  { %v1483_v36 = vadd.f32 %v1744_v34, %v1657_v15 }
 0x5c2   :  { %v1522_v37 = vpop.f32.mrb[16].mxu1 }
 0x5c3   :  { %v1523_v38 = vadd.f32 %v1522_v37, %v1483_v36  ;;  %v1775_v39 = vpop.f32.mrb[17].mxu1 }
 0x5c4   :  { %v1525_v40 = vpop.f32.mrb[18].mxu1 }
 0x5c5   :  { %v1528_v41 = vsub.f32 0.0, %v1523_v38  ;;  %v1776_v42 = vpop.f32.mrb[19].mxu1 }
 0x5c7   :  { %v1529_v4 = vmul.f32 1.442695, %v1528_v41 }
 0x5c9   :  { %1965 = vpow2.f32 %v1529_v4 }
 0x5d3   :  { %v1966_v43 = vpop.eup %1965 }
 0x5d4   :  { %v1531_v44 = vadd.f32 1.0, %v1966_v43 }
 0x5d6   :  { %1967 = vrcp.f32 %v1531_v44 }
 0x5e0   :  { %v1968_v45 = vpop.eup %1967 }
 0x5e1   :  { %1533 = vst [vmem:[#allocation10] sm:$0xff] %v1968_v45 }
 0x5e2   :  { %2068 = shalt.err (!%p2065_p8)
}
 0x5e3   :  { %s2069_s22 = scalar_lea.hbm %s2348_s11, 128 }
 0x5e4   :  { %p2070_p9 = scmp.ne.s32.totalorder %s2348_s11, %s2069_s22  ;;  %p2073_p10 = scmp.lt.u32.totalorder %s2069_s22, %s2348_s11 }
 0x5e6   :  { %p2075_p11 = pnand %p2073_p10, %p2070_p9 }
 0x5e8   :  { %2078 = shalt.err (!%p2075_p11)
}
 0x5e9   :  { %1543 = dma.vmem_to_hbm [thread:$0]  %s1541_s19, 128, %s2348_s11, [#allocation4]  }
 0x5ea   :  { %2085 = dma.done.wait [#allocation4], 128  }
 0x5eb   :  { %2086 = vsyncadd [#allocation4], 4294967168 }
 0x5ec   :  { %1547 = vsyncpa [#allocation3], 1 }
 0x5ed   :  { %1548 = vsyncpa [#allocation6], 1 }
 0x5ee   :  { %1549 = vsyncpa [#allocation9], 1 }
 0x5ef   :  { %1550 = vsyncpa [#allocation4], 1 }

</bundles_post_ra>
